<compile_context>
chip_gen: v7x
topology: tpu7x:2x2x1
jax: 0.10.0
libtpu: 0.0.40
codegen_flags: <defaults>
</compile_context>

<pallas_src>
import functools
import math

import jax
import jax.numpy as jnp
from jax.experimental import pallas as pl
from jax.experimental.pallas import tpu as pltpu

VOCAB = 5
DIM = 9
DIM_PAD = 16          # DIM zero-padded to a whole f32 sublane pair
N_LAYERS = 4
MAX_SEQ = 128


def bert_kernel(tok_ref, pos_ref, embT_ref, wqkv_ref, bqkv_ref,
                wvoc_ref, bvoc_ref, bias_ref, out_ref, *, approx_softmax):
    _, _, N = tok_ref.shape                      # N = TB * S packed tokens on lanes
    inv_sqrt_d = 1.0 / math.sqrt(DIM)            # sqrt(9) = 3

    # ---- Embedding lookup as one-hot matmul (+ positional encoding) --------------
    tok = tok_ref[0]                                                   # (1, N) int32
    vocab_iota = jax.lax.broadcasted_iota(jnp.int32, (VOCAB, N), 0)    # row v == v
    onehot = jnp.where(tok == vocab_iota, 1.0, 0.0)                    # (VOCAB, N) f32
    x = jnp.dot(embT_ref[...], onehot,
                preferred_element_type=jnp.float32) + pos_ref[...]     # (DIM_PAD, N)

    wqkv = wqkv_ref[...]                                               # (L, 48, 16)
    bqkv = bqkv_ref[...]                                               # (L, 48, 1)
    neg_bias = bias_ref[...]                                           # (N, N) 0 / -1e30

    for l in range(N_LAYERS):
        # Fused QKV projection: one matmul over the whole lane-packed slab.
        qkv = jnp.dot(wqkv[l], x,
                      preferred_element_type=jnp.float32) + bqkv[l]    # (3*DIM_PAD, N)
        q = qkv[0:DIM_PAD]                                             # (DIM_PAD, N)
        k = qkv[DIM_PAD:2 * DIM_PAD]
        v = qkv[2 * DIM_PAD:3 * DIM_PAD]

        # scores[i, j] = <q[:, i], k[:, j]> / sqrt(D), plus a block-diagonal bias that
        # masks attention between different packed sequences (-1e30 -> exp == 0).
        scores = jnp.dot(q.T, k,
                         preferred_element_type=jnp.float32) * inv_sqrt_d + neg_bias
        scores = scores - jnp.max(scores, axis=-1, keepdims=True)
        e = jnp.exp(scores)
        denom = jnp.sum(e, axis=-1, keepdims=True)
        if approx_softmax:
            # EUP approximate reciprocal (frees VALU slots); ~1e-3 error per layer.
            probs = e * pl.reciprocal(denom, approx=True)
        else:
            probs = e / denom
        # x_new[d, i] = sum_j v[d, j] * probs[i, j] -- NT contraction, no transpose.
        x = jax.lax.dot_general(v, probs, (((1,), (1,)), ((), ())),
                                preferred_element_type=jnp.float32)    # (DIM_PAD, N)

    # ---- Vocab projection + log_softmax over the vocab (sublane) axis ------------
    logits = jnp.dot(wvoc_ref[...], x,
                     preferred_element_type=jnp.float32) + bvoc_ref[...]   # (VOCAB, N)
    m = jnp.max(logits, axis=0, keepdims=True)
    shifted = logits - m
    lse = jnp.log(jnp.sum(jnp.exp(shifted), axis=0, keepdims=True))
    out_ref[0] = shifted - lse                                         # lane-dense slab


def make_pos_encoding(max_seq_len, dim):
    pe = [[0.0] * dim for _ in range(max_seq_len)]
    for position in range(max_seq_len):
        for dimension in range(dim):
            angle_rate = position / 10000 ** (2 * (dimension // 2) / dim)
            if dimension % 2 == 0:
                pe[position][dimension] = math.sin(angle_rate)
            else:
                pe[position][dimension] = math.cos(angle_rate)
    return jnp.asarray(pe, dtype=jnp.float32)


def init_params(key):
    keys = jax.random.split(key, 2 + 6 * N_LAYERS + 2)
    it = iter(keys)
    params = {
        "emb": jax.random.normal(next(it), (VOCAB, DIM), jnp.float32),
        "pos": make_pos_encoding(MAX_SEQ, DIM),
        # PyTorch-native orientation: W is (out, in), bias stored as a column (out, 1).
        "wq": jnp.stack([jax.random.normal(next(it), (DIM, DIM), jnp.float32) * 0.3
                         for _ in range(N_LAYERS)]),
        "bq": jnp.stack([jax.random.normal(next(it), (DIM, 1), jnp.float32) * 0.1
                         for _ in range(N_LAYERS)]),
        "wk": jnp.stack([jax.random.normal(next(it), (DIM, DIM), jnp.float32) * 0.3
                         for _ in range(N_LAYERS)]),
        "bk": jnp.stack([jax.random.normal(next(it), (DIM, 1), jnp.float32) * 0.1
                         for _ in range(N_LAYERS)]),
        "wv": jnp.stack([jax.random.normal(next(it), (DIM, DIM), jnp.float32) * 0.3
                         for _ in range(N_LAYERS)]),
        "bv": jnp.stack([jax.random.normal(next(it), (DIM, 1), jnp.float32) * 0.1
                         for _ in range(N_LAYERS)]),
        "w_vocab": jax.random.normal(next(it), (VOCAB, DIM), jnp.float32) * 0.3,
        "b_vocab": jax.random.normal(next(it), (VOCAB, 1), jnp.float32) * 0.1,
    }
    return params


def _pad2(a, rows, cols):
    """Zero-pad a 2-D array to (rows, cols)."""
    return jnp.zeros((rows, cols), a.dtype).at[:a.shape[0], :a.shape[1]].set(a)


def bert_forward(tokens, params, *, approx_softmax=True):
    """tokens: int32 (B, S) with values in [0, VOCAB). Returns log-probs (B, S, VOCAB)."""
    B, S = tokens.shape
    assert S <= MAX_SEQ
    # Pack TB sequences onto the 128-wide lane axis: N = TB*S <= 128.
    TB = max(1, min(B, MAX_SEQ // S))
    num_blocks = pl.cdiv(B, TB)
    B_pad = num_blocks * TB
    N = TB * S

    # Pad the batch to a whole number of blocks with token 0.  The padded rows produce
    # real (but discarded) work; outputs are sliced back to B below.  Do NOT "fix" this
    # by masking -- it is intentional and benign.
    if B_pad != B:
        tokens = jnp.concatenate(
            [tokens, jnp.zeros((B_pad - B, S), tokens.dtype)], axis=0)
    tokens_flat = tokens.reshape(num_blocks, 1, N)                     # lane-packed ids

    # Host-side packing / padding (DIM 9 -> 16, fused QKV, lane-tiled pos encoding).
    posT_pad = _pad2(params["pos"][:S, :].T, DIM_PAD, S)               # (16, S)
    pos_tiled = jnp.tile(posT_pad, (1, TB))                            # (16, N)
    embT_pad = _pad2(params["emb"].T, DIM_PAD, VOCAB)                  # (16, 5)
    wqkv = jnp.stack([
        jnp.concatenate([_pad2(params["wq"][l], DIM_PAD, DIM_PAD),
                         _pad2(params["wk"][l], DIM_PAD, DIM_PAD),
                         _pad2(params["wv"][l], DIM_PAD, DIM_PAD)], axis=0)
        for l in range(N_LAYERS)])                                     # (L, 48, 16)
    bqkv = jnp.stack([
        jnp.concatenate([_pad2(params["bq"][l], DIM_PAD, 1),
                         _pad2(params["bk"][l], DIM_PAD, 1),
                         _pad2(params["bv"][l], DIM_PAD, 1)], axis=0)
        for l in range(N_LAYERS)])                                     # (L, 48, 1)
    w_vocab_pad = _pad2(params["w_vocab"], VOCAB, DIM_PAD)             # (5, 16)
    b_vocab = params["b_vocab"]                                        # (5, 1)

    # Block-diagonal attention bias: 0 within a packed sequence, -1e30 across them.
    seq_id = jnp.arange(N, dtype=jnp.int32) // S
    neg_bias = jnp.where(seq_id[:, None] == seq_id[None, :],
                         0.0, -1e30).astype(jnp.float32)               # (N, N)

    grid_spec = pltpu.PrefetchScalarGridSpec(
        num_scalar_prefetch=0,
        grid=(num_blocks,),
        in_specs=[
            pl.BlockSpec((1, 1, N), lambda i: (i, 0, 0)),                   # tokens
            pl.BlockSpec((DIM_PAD, N), lambda i: (0, 0)),                   # pos (tiled)
            pl.BlockSpec((DIM_PAD, VOCAB), lambda i: (0, 0)),               # emb^T
            pl.BlockSpec((N_LAYERS, 3 * DIM_PAD, DIM_PAD), lambda i: (0, 0, 0)),  # W_QKV
            pl.BlockSpec((N_LAYERS, 3 * DIM_PAD, 1), lambda i: (0, 0, 0)),       # b_QKV
            pl.BlockSpec((VOCAB, DIM_PAD), lambda i: (0, 0)),               # W_vocab
            pl.BlockSpec((VOCAB, 1), lambda i: (0, 0)),                     # b_vocab
            pl.BlockSpec((N, N), lambda i: (0, 0)),                         # attn bias
        ],
        out_specs=pl.BlockSpec((1, VOCAB, N), lambda i: (i, 0, 0)),
    )

    out_t = pl.pallas_call(
        functools.partial(bert_kernel, approx_softmax=approx_softmax),
        out_shape=jax.ShapeDtypeStruct((num_blocks, VOCAB, N), jnp.float32),
        grid_spec=grid_spec,
        compiler_params=pltpu.CompilerParams(
            dimension_semantics=("parallel",)),
    )(tokens_flat, pos_tiled, embT_pad, wqkv, bqkv, w_vocab_pad, b_vocab, neg_bias)

    # (num_blocks, VOCAB, TB*S) -> (B, S, VOCAB)
    out = out_t.reshape(num_blocks, VOCAB, TB, S)
    out = jnp.transpose(out, (0, 2, 3, 1)).reshape(B_pad, S, VOCAB)
    return out[:B]


def bert_reference(tokens, params):
    """Pure-JAX reference (exact softmax division), matches the PyTorch module."""
    x = params["emb"][tokens] + params["pos"][:tokens.shape[1], :]          # (B, S, DIM)
    for l in range(N_LAYERS):
        q = jnp.einsum("bsd,od->bso", x, params["wq"][l]) + params["bq"][l][:, 0]
        k = jnp.einsum("bsd,od->bso", x, params["wk"][l]) + params["bk"][l][:, 0]
        v = jnp.einsum("bsd,od->bso", x, params["wv"][l]) + params["bv"][l][:, 0]
        scores = jnp.einsum("bqd,bkd->bqk", q, k) / math.sqrt(DIM)
        probs = jax.nn.softmax(scores, axis=-1)
        x = jnp.einsum("bqk,bkd->bqd", probs, v)
    logits = jnp.einsum("bsd,vd->bsv", x, params["w_vocab"]) + params["b_vocab"][:, 0]
    return jax.nn.log_softmax(logits, axis=-1)


def _check_case(params, tkey, B, S):
    tokens = jax.random.randint(tkey, (B, S), 0, VOCAB, dtype=jnp.int32)
    log_probs = bert_forward(tokens, params)
    jax.block_until_ready(log_probs)

    assert log_probs.shape == (B, S, VOCAB)
    assert log_probs.dtype == jnp.float32

    # log_softmax sanity (exact path -- no approx reciprocal involved here).
    row_sums = jnp.exp(log_probs).sum(axis=-1)
    assert bool(jnp.all(jnp.abs(row_sums - 1.0) < 1e-4))

    # Pure-JAX reference check.  Loose tolerance only absorbs the EUP approximate
    # reciprocal used for the 4 in-kernel attention-softmax normalisations
    # (with approx_softmax=False it matches to ~1e-6).
    ref = bert_reference(tokens, params)
    assert bool(jnp.max(jnp.abs(log_probs - ref)) < 5e-2)


if __name__ == "__main__":
    key = jax.random.PRNGKey(0)
    pkey, tkey1, tkey2 = jax.random.split(key, 3)

    params = init_params(pkey)

    # Primary small case (matches the module's intended use): batch=2, seq=8.
    _check_case(params, tkey1, B=2, S=8)
    # Secondary case exercising lane-packing, multi-block grid and batch padding.
    _check_case(params, tkey2, B=5, S=48)

    print("KERNEL_OK")
</pallas_src>

<mosaic_0001>
module attributes {stable_mosaic.version = 11 : i64} {
  func.func @bert_kernel(%arg0: i32, %arg1: memref<1x1x16xi32, #tpu.memory_space<vmem>>, %arg2: memref<16x16xf32, #tpu.memory_space<vmem>>, %arg3: memref<16x5xf32, #tpu.memory_space<vmem>>, %arg4: memref<4x48x16xf32, #tpu.memory_space<vmem>>, %arg5: memref<4x48x1xf32, #tpu.memory_space<vmem>>, %arg6: memref<5x16xf32, #tpu.memory_space<vmem>>, %arg7: memref<5x1xf32, #tpu.memory_space<vmem>>, %arg8: memref<16x16xf32, #tpu.memory_space<vmem>>, %arg9: memref<1x5x16xf32, #tpu.memory_space<vmem>>) attributes {dimension_semantics = [#tpu.dimension_semantics<parallel>], iteration_bounds = array<i64: 1>, scalar_prefetch = 0 : i64, scratch_operands = 0 : i64, tpu.core_type = #tpu.core_type<tc>, window_params = [{transform_indices = @transform_0, window_bounds = array<i64: 1, 1, 16>}, {pipeline_mode = #tpu.pipeline_mode<synchronous>, transform_indices = @transform_1, window_bounds = array<i64: 16, 16>}, {pipeline_mode = #tpu.pipeline_mode<synchronous>, transform_indices = @transform_2, window_bounds = array<i64: 16, 5>}, {pipeline_mode = #tpu.pipeline_mode<synchronous>, transform_indices = @transform_3, window_bounds = array<i64: 4, 48, 16>}, {pipeline_mode = #tpu.pipeline_mode<synchronous>, transform_indices = @transform_4, window_bounds = array<i64: 4, 48, 1>}, {pipeline_mode = #tpu.pipeline_mode<synchronous>, transform_indices = @transform_5, window_bounds = array<i64: 5, 16>}, {pipeline_mode = #tpu.pipeline_mode<synchronous>, transform_indices = @transform_6, window_bounds = array<i64: 5, 1>}, {pipeline_mode = #tpu.pipeline_mode<synchronous>, transform_indices = @transform_7, window_bounds = array<i64: 16, 16>}, {transform_indices = @transform_8, window_bounds = array<i64: 1, 5, 16>}]} {
    %c0 = arith.constant 0 : index
    %c0_0 = arith.constant 0 : index
    %c0_1 = arith.constant 0 : index
    %0 = vector.load %arg1[%c0, %c0_0, %c0_1] : memref<1x1x16xi32, #tpu.memory_space<vmem>>, vector<1x1x16xi32>
    %1 = vector.shape_cast %0 : vector<1x1x16xi32> to vector<1x16xi32>
    %2 = tpu.iota {dimensions = array<i32: 0>} : vector<5x16xi32>
    %3 = vector.broadcast %1 : vector<1x16xi32> to vector<5x16xi32>
    %4 = arith.cmpi eq, %3, %2 : vector<5x16xi32>
    %cst = arith.constant 1.000000e+00 : f32
    %cst_2 = arith.constant 0.000000e+00 : f32
    %5 = vector.broadcast %cst : f32 to vector<5x16xf32>
    %6 = vector.broadcast %cst_2 : f32 to vector<5x16xf32>
    %7 = arith.select %4, %5, %6 : vector<5x16xi1>, vector<5x16xf32>
    %c0_3 = arith.constant 0 : index
    %c0_4 = arith.constant 0 : index
    %8 = vector.load %arg3[%c0_3, %c0_4] : memref<16x5xf32, #tpu.memory_space<vmem>>, vector<16x5xf32>
    %cst_5 = arith.constant dense<0.000000e+00> : vector<16x16xf32>
    %9 = tpu.matmul %8, %7, %cst_5 {dimension_numbers = #tpu.dot_dimension_numbers<[1], [0], [0], [1], [0, 0, 1, 1], [], []>} : vector<16x5xf32>, vector<5x16xf32>, vector<16x16xf32> -> vector<16x16xf32>
    %c0_6 = arith.constant 0 : index
    %c0_7 = arith.constant 0 : index
    %10 = vector.load %arg2[%c0_6, %c0_7] : memref<16x16xf32, #tpu.memory_space<vmem>>, vector<16x16xf32>
    %11 = arith.addf %9, %10 : vector<16x16xf32>
    %c0_8 = arith.constant 0 : index
    %c0_9 = arith.constant 0 : index
    %c0_10 = arith.constant 0 : index
    %12 = vector.load %arg4[%c0_8, %c0_9, %c0_10] : memref<4x48x16xf32, #tpu.memory_space<vmem>>, vector<4x48x16xf32>
    %c0_11 = arith.constant 0 : index
    %c0_12 = arith.constant 0 : index
    %c0_13 = arith.constant 0 : index
    %13 = vector.load %arg5[%c0_11, %c0_12, %c0_13] : memref<4x48x1xf32, #tpu.memory_space<vmem>>, vector<4x48x1xf32>
    %c0_14 = arith.constant 0 : index
    %c0_15 = arith.constant 0 : index
    %14 = vector.load %arg8[%c0_14, %c0_15] : memref<16x16xf32, #tpu.memory_space<vmem>>, vector<16x16xf32>
    %15 = vector.extract_strided_slice %12 {offsets = [0, 0, 0], sizes = [1, 48, 16], strides = [1, 1, 1]} : vector<4x48x16xf32> to vector<1x48x16xf32>
    %16 = vector.shape_cast %15 : vector<1x48x16xf32> to vector<48x16xf32>
    %cst_16 = arith.constant dense<0.000000e+00> : vector<48x16xf32>
    %17 = tpu.matmul %16, %11, %cst_16 {dimension_numbers = #tpu.dot_dimension_numbers<[1], [0], [0], [1], [0, 0, 1, 1], [], []>} : vector<48x16xf32>, vector<16x16xf32>, vector<48x16xf32> -> vector<48x16xf32>
    %18 = vector.extract_strided_slice %13 {offsets = [0, 0, 0], sizes = [1, 48, 1], strides = [1, 1, 1]} : vector<4x48x1xf32> to vector<1x48x1xf32>
    %19 = vector.shape_cast %18 : vector<1x48x1xf32> to vector<48x1xf32>
    %20 = vector.broadcast %19 : vector<48x1xf32> to vector<48x16xf32>
    %21 = arith.addf %17, %20 : vector<48x16xf32>
    %22 = vector.extract_strided_slice %21 {offsets = [0, 0], sizes = [16, 16], strides = [1, 1]} : vector<48x16xf32> to vector<16x16xf32>
    %23 = vector.extract_strided_slice %21 {offsets = [16, 0], sizes = [16, 16], strides = [1, 1]} : vector<48x16xf32> to vector<16x16xf32>
    %24 = vector.extract_strided_slice %21 {offsets = [32, 0], sizes = [16, 16], strides = [1, 1]} : vector<48x16xf32> to vector<16x16xf32>
    %25 = tpu.transpose %22, [1, 0] : vector<16x16xf32> -> vector<16x16xf32>
    %cst_17 = arith.constant dense<0.000000e+00> : vector<16x16xf32>
    %26 = tpu.matmul %25, %23, %cst_17 {dimension_numbers = #tpu.dot_dimension_numbers<[1], [0], [0], [1], [0, 0, 1, 1], [], []>} : vector<16x16xf32>, vector<16x16xf32>, vector<16x16xf32> -> vector<16x16xf32>
    %cst_18 = arith.constant 0.333333343 : f32
    %27 = vector.broadcast %cst_18 : f32 to vector<16x16xf32>
    %28 = arith.mulf %26, %27 : vector<16x16xf32>
    %29 = arith.addf %28, %14 : vector<16x16xf32>
    %cst_19 = arith.constant dense<0xFF800000> : vector<16xf32>
    %30 = vector.multi_reduction <maximumf>, %29, %cst_19 [1] : vector<16x16xf32> to vector<16xf32>
    %31 = vector.shape_cast %30 : vector<16xf32> to vector<16x1xf32>
    %32 = vector.broadcast %31 : vector<16x1xf32> to vector<16x16xf32>
    %33 = arith.subf %29, %32 : vector<16x16xf32>
    %34 = math.exp %33 : vector<16x16xf32>
    %cst_20 = arith.constant dense<0.000000e+00> : vector<16xf32>
    %35 = vector.multi_reduction <add>, %34, %cst_20 [1] : vector<16x16xf32> to vector<16xf32>
    %36 = vector.shape_cast %35 : vector<16xf32> to vector<16x1xf32>
    %37 = tpu.reciprocal %36 {approx = true} : vector<16x1xf32> -> vector<16x1xf32>
    %38 = vector.broadcast %37 : vector<16x1xf32> to vector<16x16xf32>
    %39 = arith.mulf %34, %38 : vector<16x16xf32>
    %cst_21 = arith.constant dense<0.000000e+00> : vector<16x16xf32>
    %40 = tpu.matmul %24, %39, %cst_21 {dimension_numbers = #tpu.dot_dimension_numbers<[1], [1], [0], [0], [0, 0, 1, 0], [], []>} : vector<16x16xf32>, vector<16x16xf32>, vector<16x16xf32> -> vector<16x16xf32>
    %41 = vector.extract_strided_slice %12 {offsets = [1, 0, 0], sizes = [1, 48, 16], strides = [1, 1, 1]} : vector<4x48x16xf32> to vector<1x48x16xf32>
    %42 = vector.shape_cast %41 : vector<1x48x16xf32> to vector<48x16xf32>
    %cst_22 = arith.constant dense<0.000000e+00> : vector<48x16xf32>
    %43 = tpu.matmul %42, %40, %cst_22 {dimension_numbers = #tpu.dot_dimension_numbers<[1], [0], [0], [1], [0, 0, 1, 1], [], []>} : vector<48x16xf32>, vector<16x16xf32>, vector<48x16xf32> -> vector<48x16xf32>
    %44 = vector.extract_strided_slice %13 {offsets = [1, 0, 0], sizes = [1, 48, 1], strides = [1, 1, 1]} : vector<4x48x1xf32> to vector<1x48x1xf32>
    %45 = vector.shape_cast %44 : vector<1x48x1xf32> to vector<48x1xf32>
    %46 = vector.broadcast %45 : vector<48x1xf32> to vector<48x16xf32>
    %47 = arith.addf %43, %46 : vector<48x16xf32>
    %48 = vector.extract_strided_slice %47 {offsets = [0, 0], sizes = [16, 16], strides = [1, 1]} : vector<48x16xf32> to vector<16x16xf32>
    %49 = vector.extract_strided_slice %47 {offsets = [16, 0], sizes = [16, 16], strides = [1, 1]} : vector<48x16xf32> to vector<16x16xf32>
    %50 = vector.extract_strided_slice %47 {offsets = [32, 0], sizes = [16, 16], strides = [1, 1]} : vector<48x16xf32> to vector<16x16xf32>
    %51 = tpu.transpose %48, [1, 0] : vector<16x16xf32> -> vector<16x16xf32>
    %cst_23 = arith.constant dense<0.000000e+00> : vector<16x16xf32>
    %52 = tpu.matmul %51, %49, %cst_23 {dimension_numbers = #tpu.dot_dimension_numbers<[1], [0], [0], [1], [0, 0, 1, 1], [], []>} : vector<16x16xf32>, vector<16x16xf32>, vector<16x16xf32> -> vector<16x16xf32>
    %cst_24 = arith.constant 0.333333343 : f32
    %53 = vector.broadcast %cst_24 : f32 to vector<16x16xf32>
    %54 = arith.mulf %52, %53 : vector<16x16xf32>
    %55 = arith.addf %54, %14 : vector<16x16xf32>
    %cst_25 = arith.constant dense<0xFF800000> : vector<16xf32>
    %56 = vector.multi_reduction <maximumf>, %55, %cst_25 [1] : vector<16x16xf32> to vector<16xf32>
    %57 = vector.shape_cast %56 : vector<16xf32> to vector<16x1xf32>
    %58 = vector.broadcast %57 : vector<16x1xf32> to vector<16x16xf32>
    %59 = arith.subf %55, %58 : vector<16x16xf32>
    %60 = math.exp %59 : vector<16x16xf32>
    %cst_26 = arith.constant dense<0.000000e+00> : vector<16xf32>
    %61 = vector.multi_reduction <add>, %60, %cst_26 [1] : vector<16x16xf32> to vector<16xf32>
    %62 = vector.shape_cast %61 : vector<16xf32> to vector<16x1xf32>
    %63 = tpu.reciprocal %62 {approx = true} : vector<16x1xf32> -> vector<16x1xf32>
    %64 = vector.broadcast %63 : vector<16x1xf32> to vector<16x16xf32>
    %65 = arith.mulf %60, %64 : vector<16x16xf32>
    %cst_27 = arith.constant dense<0.000000e+00> : vector<16x16xf32>
    %66 = tpu.matmul %50, %65, %cst_27 {dimension_numbers = #tpu.dot_dimension_numbers<[1], [1], [0], [0], [0, 0, 1, 0], [], []>} : vector<16x16xf32>, vector<16x16xf32>, vector<16x16xf32> -> vector<16x16xf32>
    %67 = vector.extract_strided_slice %12 {offsets = [2, 0, 0], sizes = [1, 48, 16], strides = [1, 1, 1]} : vector<4x48x16xf32> to vector<1x48x16xf32>
    %68 = vector.shape_cast %67 : vector<1x48x16xf32> to vector<48x16xf32>
    %cst_28 = arith.constant dense<0.000000e+00> : vector<48x16xf32>
    %69 = tpu.matmul %68, %66, %cst_28 {dimension_numbers = #tpu.dot_dimension_numbers<[1], [0], [0], [1], [0, 0, 1, 1], [], []>} : vector<48x16xf32>, vector<16x16xf32>, vector<48x16xf32> -> vector<48x16xf32>
    %70 = vector.extract_strided_slice %13 {offsets = [2, 0, 0], sizes = [1, 48, 1], strides = [1, 1, 1]} : vector<4x48x1xf32> to vector<1x48x1xf32>
    %71 = vector.shape_cast %70 : vector<1x48x1xf32> to vector<48x1xf32>
    %72 = vector.broadcast %71 : vector<48x1xf32> to vector<48x16xf32>
    %73 = arith.addf %69, %72 : vector<48x16xf32>
    %74 = vector.extract_strided_slice %73 {offsets = [0, 0], sizes = [16, 16], strides = [1, 1]} : vector<48x16xf32> to vector<16x16xf32>
    %75 = vector.extract_strided_slice %73 {offsets = [16, 0], sizes = [16, 16], strides = [1, 1]} : vector<48x16xf32> to vector<16x16xf32>
    %76 = vector.extract_strided_slice %73 {offsets = [32, 0], sizes = [16, 16], strides = [1, 1]} : vector<48x16xf32> to vector<16x16xf32>
    %77 = tpu.transpose %74, [1, 0] : vector<16x16xf32> -> vector<16x16xf32>
    %cst_29 = arith.constant dense<0.000000e+00> : vector<16x16xf32>
    %78 = tpu.matmul %77, %75, %cst_29 {dimension_numbers = #tpu.dot_dimension_numbers<[1], [0], [0], [1], [0, 0, 1, 1], [], []>} : vector<16x16xf32>, vector<16x16xf32>, vector<16x16xf32> -> vector<16x16xf32>
    %cst_30 = arith.constant 0.333333343 : f32
    %79 = vector.broadcast %cst_30 : f32 to vector<16x16xf32>
    %80 = arith.mulf %78, %79 : vector<16x16xf32>
    %81 = arith.addf %80, %14 : vector<16x16xf32>
    %cst_31 = arith.constant dense<0xFF800000> : vector<16xf32>
    %82 = vector.multi_reduction <maximumf>, %81, %cst_31 [1] : vector<16x16xf32> to vector<16xf32>
    %83 = vector.shape_cast %82 : vector<16xf32> to vector<16x1xf32>
    %84 = vector.broadcast %83 : vector<16x1xf32> to vector<16x16xf32>
    %85 = arith.subf %81, %84 : vector<16x16xf32>
    %86 = math.exp %85 : vector<16x16xf32>
    %cst_32 = arith.constant dense<0.000000e+00> : vector<16xf32>
    %87 = vector.multi_reduction <add>, %86, %cst_32 [1] : vector<16x16xf32> to vector<16xf32>
    %88 = vector.shape_cast %87 : vector<16xf32> to vector<16x1xf32>
    %89 = tpu.reciprocal %88 {approx = true} : vector<16x1xf32> -> vector<16x1xf32>
    %90 = vector.broadcast %89 : vector<16x1xf32> to vector<16x16xf32>
    %91 = arith.mulf %86, %90 : vector<16x16xf32>
    %cst_33 = arith.constant dense<0.000000e+00> : vector<16x16xf32>
    %92 = tpu.matmul %76, %91, %cst_33 {dimension_numbers = #tpu.dot_dimension_numbers<[1], [1], [0], [0], [0, 0, 1, 0], [], []>} : vector<16x16xf32>, vector<16x16xf32>, vector<16x16xf32> -> vector<16x16xf32>
    %93 = vector.extract_strided_slice %12 {offsets = [3, 0, 0], sizes = [1, 48, 16], strides = [1, 1, 1]} : vector<4x48x16xf32> to vector<1x48x16xf32>
    %94 = vector.shape_cast %93 : vector<1x48x16xf32> to vector<48x16xf32>
    %cst_34 = arith.constant dense<0.000000e+00> : vector<48x16xf32>
    %95 = tpu.matmul %94, %92, %cst_34 {dimension_numbers = #tpu.dot_dimension_numbers<[1], [0], [0], [1], [0, 0, 1, 1], [], []>} : vector<48x16xf32>, vector<16x16xf32>, vector<48x16xf32> -> vector<48x16xf32>
    %96 = vector.extract_strided_slice %13 {offsets = [3, 0, 0], sizes = [1, 48, 1], strides = [1, 1, 1]} : vector<4x48x1xf32> to vector<1x48x1xf32>
    %97 = vector.shape_cast %96 : vector<1x48x1xf32> to vector<48x1xf32>
    %98 = vector.broadcast %97 : vector<48x1xf32> to vector<48x16xf32>
    %99 = arith.addf %95, %98 : vector<48x16xf32>
    %100 = vector.extract_strided_slice %99 {offsets = [0, 0], sizes = [16, 16], strides = [1, 1]} : vector<48x16xf32> to vector<16x16xf32>
    %101 = vector.extract_strided_slice %99 {offsets = [16, 0], sizes = [16, 16], strides = [1, 1]} : vector<48x16xf32> to vector<16x16xf32>
    %102 = vector.extract_strided_slice %99 {offsets = [32, 0], sizes = [16, 16], strides = [1, 1]} : vector<48x16xf32> to vector<16x16xf32>
    %103 = tpu.transpose %100, [1, 0] : vector<16x16xf32> -> vector<16x16xf32>
    %cst_35 = arith.constant dense<0.000000e+00> : vector<16x16xf32>
    %104 = tpu.matmul %103, %101, %cst_35 {dimension_numbers = #tpu.dot_dimension_numbers<[1], [0], [0], [1], [0, 0, 1, 1], [], []>} : vector<16x16xf32>, vector<16x16xf32>, vector<16x16xf32> -> vector<16x16xf32>
    %cst_36 = arith.constant 0.333333343 : f32
    %105 = vector.broadcast %cst_36 : f32 to vector<16x16xf32>
    %106 = arith.mulf %104, %105 : vector<16x16xf32>
    %107 = arith.addf %106, %14 : vector<16x16xf32>
    %cst_37 = arith.constant dense<0xFF800000> : vector<16xf32>
    %108 = vector.multi_reduction <maximumf>, %107, %cst_37 [1] : vector<16x16xf32> to vector<16xf32>
    %109 = vector.shape_cast %108 : vector<16xf32> to vector<16x1xf32>
    %110 = vector.broadcast %109 : vector<16x1xf32> to vector<16x16xf32>
    %111 = arith.subf %107, %110 : vector<16x16xf32>
    %112 = math.exp %111 : vector<16x16xf32>
    %cst_38 = arith.constant dense<0.000000e+00> : vector<16xf32>
    %113 = vector.multi_reduction <add>, %112, %cst_38 [1] : vector<16x16xf32> to vector<16xf32>
    %114 = vector.shape_cast %113 : vector<16xf32> to vector<16x1xf32>
    %115 = tpu.reciprocal %114 {approx = true} : vector<16x1xf32> -> vector<16x1xf32>
    %116 = vector.broadcast %115 : vector<16x1xf32> to vector<16x16xf32>
    %117 = arith.mulf %112, %116 : vector<16x16xf32>
    %cst_39 = arith.constant dense<0.000000e+00> : vector<16x16xf32>
    %118 = tpu.matmul %102, %117, %cst_39 {dimension_numbers = #tpu.dot_dimension_numbers<[1], [1], [0], [0], [0, 0, 1, 0], [], []>} : vector<16x16xf32>, vector<16x16xf32>, vector<16x16xf32> -> vector<16x16xf32>
    %c0_40 = arith.constant 0 : index
    %c0_41 = arith.constant 0 : index
    %119 = vector.load %arg6[%c0_40, %c0_41] : memref<5x16xf32, #tpu.memory_space<vmem>>, vector<5x16xf32>
    %cst_42 = arith.constant dense<0.000000e+00> : vector<5x16xf32>
    %120 = tpu.matmul %119, %118, %cst_42 {dimension_numbers = #tpu.dot_dimension_numbers<[1], [0], [0], [1], [0, 0, 1, 1], [], []>} : vector<5x16xf32>, vector<16x16xf32>, vector<5x16xf32> -> vector<5x16xf32>
    %c0_43 = arith.constant 0 : index
    %c0_44 = arith.constant 0 : index
    %121 = vector.load %arg7[%c0_43, %c0_44] : memref<5x1xf32, #tpu.memory_space<vmem>>, vector<5x1xf32>
    %122 = vector.broadcast %121 : vector<5x1xf32> to vector<5x16xf32>
    %123 = arith.addf %120, %122 : vector<5x16xf32>
    %cst_45 = arith.constant dense<0xFF800000> : vector<16xf32>
    %124 = vector.multi_reduction <maximumf>, %123, %cst_45 [0] : vector<5x16xf32> to vector<16xf32>
    %125 = vector.shape_cast %124 : vector<16xf32> to vector<1x16xf32>
    %126 = vector.broadcast %125 : vector<1x16xf32> to vector<5x16xf32>
    %127 = arith.subf %123, %126 : vector<5x16xf32>
    %128 = math.exp %127 : vector<5x16xf32>
    %cst_46 = arith.constant dense<0.000000e+00> : vector<16xf32>
    %129 = vector.multi_reduction <add>, %128, %cst_46 [0] : vector<5x16xf32> to vector<16xf32>
    %130 = vector.shape_cast %129 : vector<16xf32> to vector<1x16xf32>
    %131 = math.log %130 : vector<1x16xf32>
    %132 = vector.broadcast %131 : vector<1x16xf32> to vector<5x16xf32>
    %133 = arith.subf %127, %132 : vector<5x16xf32>
    %c0_47 = arith.constant 0 : index
    %c0_48 = arith.constant 0 : index
    %c0_49 = arith.constant 0 : index
    %134 = vector.load %arg9[%c0_47, %c0_48, %c0_49] : memref<1x5x16xf32, #tpu.memory_space<vmem>>, vector<1x5x16xf32>
    %135 = vector.shape_cast %134 : vector<1x5x16xf32> to vector<5x16xf32>
    %136 = vector.shape_cast %133 : vector<5x16xf32> to vector<1x5x16xf32>
    tpu.vector_store %arg9[%c0_47, %c0_48, %c0_49], %136 {strides = array<i32>} : memref<1x5x16xf32, #tpu.memory_space<vmem>>, vector<1x5x16xf32>,
    return
  }
  func.func @transform_0(%arg0: i32) -> (i32, i32, i32) {
    %c0_i32 = arith.constant 0 : i32
    %c0_i32_0 = arith.constant 0 : i32
    %c0_i32_1 = arith.constant 0 : i32
    return %arg0, %c0_i32, %c0_i32_0 : i32, i32, i32
  }
  func.func @transform_1(%arg0: i32) -> (i32, i32) {
    %c0_i32 = arith.constant 0 : i32
    %c0_i32_0 = arith.constant 0 : i32
    %c0_i32_1 = arith.constant 0 : i32
    return %c0_i32, %c0_i32_0 : i32, i32
  }
  func.func @transform_2(%arg0: i32) -> (i32, i32) {
    %c0_i32 = arith.constant 0 : i32
    %c0_i32_0 = arith.constant 0 : i32
    %c0_i32_1 = arith.constant 0 : i32
    return %c0_i32, %c0_i32_0 : i32, i32
  }
  func.func @transform_3(%arg0: i32) -> (i32, i32, i32) {
    %c0_i32 = arith.constant 0 : i32
    %c0_i32_0 = arith.constant 0 : i32
    %c0_i32_1 = arith.constant 0 : i32
    %c0_i32_2 = arith.constant 0 : i32
    return %c0_i32, %c0_i32_0, %c0_i32_1 : i32, i32, i32
  }
  func.func @transform_4(%arg0: i32) -> (i32, i32, i32) {
    %c0_i32 = arith.constant 0 : i32
    %c0_i32_0 = arith.constant 0 : i32
    %c0_i32_1 = arith.constant 0 : i32
    %c0_i32_2 = arith.constant 0 : i32
    return %c0_i32, %c0_i32_0, %c0_i32_1 : i32, i32, i32
  }
  func.func @transform_5(%arg0: i32) -> (i32, i32) {
    %c0_i32 = arith.constant 0 : i32
    %c0_i32_0 = arith.constant 0 : i32
    %c0_i32_1 = arith.constant 0 : i32
    return %c0_i32, %c0_i32_0 : i32, i32
  }
  func.func @transform_6(%arg0: i32) -> (i32, i32) {
    %c0_i32 = arith.constant 0 : i32
    %c0_i32_0 = arith.constant 0 : i32
    %c0_i32_1 = arith.constant 0 : i32
    return %c0_i32, %c0_i32_0 : i32, i32
  }
  func.func @transform_7(%arg0: i32) -> (i32, i32) {
    %c0_i32 = arith.constant 0 : i32
    %c0_i32_0 = arith.constant 0 : i32
    %c0_i32_1 = arith.constant 0 : i32
    return %c0_i32, %c0_i32_0 : i32, i32
  }
  func.func @transform_8(%arg0: i32) -> (i32, i32, i32) {
    %c0_i32 = arith.constant 0 : i32
    %c0_i32_0 = arith.constant 0 : i32
    %c0_i32_1 = arith.constant 0 : i32
    return %arg0, %c0_i32, %c0_i32_0 : i32, i32, i32
  }
}

</mosaic_0001>

<bundles_post_ra>
// kernel: tpu_custom_call.1
= control target key start
LH: loop header
LB: loop body
LE: loop exit
PB: predicated region body
PF: predicated region fallthrough
CT: control target
= control target key end

     0   :  { %v30_v0 = vlaneseq  ;;  %vm42_vm0 = vcmask 39936   ;;  %vm49_vm1 = vcmask 1044480   ;;  %v2105_v4 = vmov 0.0   ;;  %s2424_s0 = inlined_call_operand.vmem [shape: s32[1,1,16], index: 0, kind: input, shape index: {}]   ;;  %s2425_s2 = inlined_call_operand.vmem [shape: f32[16,5], index: 2, kind: input, shape index: {}]   ;;  %s2426_s3 = inlined_call_operand.vmem [shape: f32[4,48,16], index: 3, kind: input, shape index: {}]   ;;  %s2427_s4 = inlined_call_operand.vmem [shape: f32[4,48,1], index: 4, kind: input, shape index: {}]   ;;  %s2428_s1 = inlined_call_operand.vmem [shape: f32[16,16], index: 1, kind: input, shape index: {}]   ;;  %s2429_s7 = inlined_call_operand.vmem [shape: f32[16,16], index: 7, kind: input, shape index: {}]   ;;  %s2430_s6 = inlined_call_operand.vmem [shape: f32[5,1], index: 6, kind: input, shape index: {}]   ;;  %s2431_s5 = inlined_call_operand.vmem [shape: f32[5,16], index: 5, kind: input, shape index: {}]   ;;  %s2432_s8 = inlined_call_operand.vmem [shape: f32[1,5,16], index: 8, kind: output, shape index: {}]  }
   0x1   :  { %v1761_v1 = vld [vmem:[%s2424_s0] ss:$0 sm:$0xff]  ;;  %v39_v6 = vld [vmem:[%s2425_s2 + $0x8] sm:$0xff]  ;;  %vm208_vm3 = vcmask 130048   ;;  %v2106_v8 = vmov 0   ;;  %v154_v11 = vld [vmem:[%s2427_s4 + $0x10] sm:$0xff] }
   0x2   :  { %v38_v2 = vld [vmem:[%s2425_s2] sm:$0xff]  ;;  %v31_v3 = vshrl.u32 %v30_v0, 7  ;;  %2067 = vset.pattern.permute.xlu0 %v2106_v8  ;;  %2068 = vset.pattern.permute.xlu1 %v2106_v8  ;;  %v153_v10 = vld [vmem:[%s2427_s4 + $0x8] sm:$0xff]  ;;  %v155_v12 = vld [vmem:[%s2427_s4 + $0x18] sm:$0xff]  ;;  %vm2108_vm5 = vmmov 0   ;;  %vm1735_vm6 = vcmask 126976  }
   0x3   :  { %1886 = vmatprep.mubr.msk.f32.mxu0 %vm42_vm0, %v38_v2  ;;  %v128_v7 = vld [vmem:[%s2426_s3] sm:$0xff]  ;;  %190 = vperm.xlu1 %2068, %v154_v11   ;;  %v41_v13 = vld [vmem:[%s2428_s1 + $0x8] sm:$0xff]  ;;  %v130_v21 = vld [vmem:[%s2426_s3 + $0x10] sm:$0xff] }
   0x4   :  { %vm36_vm2 = vcmp.eq.s32.totalorder %v1761_v1, %v31_v3  ;;  %1893 = vmatprep.mubr.msk.f32.mxu1 %vm208_vm3, %v128_v7  ;;  %v152_v9 = vld [vmem:[%s2427_s4] sm:$0xff]  ;;  %v129_v20 = vld [vmem:[%s2426_s3 + $0x8] sm:$0xff]  ;;  %v131_v22 = vld [vmem:[%s2426_s3 + $0x18] sm:$0xff] }
   0x5   :  { %v37_v5 = vsel %vm36_vm2, 1.0, %v2105_v4  ;;  %180 = vperm.xlu0 %2067, %v152_v9   ;;  %v40_v14 = vld [vmem:[%s2428_s1] sm:$0xff]  ;;  %v133_v37 = vld [vmem:[%s2426_s3 + $0x28] sm:$0xff]  ;;  %v158_v2 = vld [vmem:[%s2427_s4 + $0x30] sm:$0xff] }
   0x6   :  { %1884 = vmatprep.subr.msk.mxu0 %vm49_vm1, %v37_v5  ;;  %v132_v36 = vld [vmem:[%s2426_s3 + $0x20] sm:$0xff]  ;;  %v2211_v41 = vld [vmem:[%s2429_s7 + $0x8] sm:$0xff]  ;;  %v159_v3 = vld [vmem:[%s2427_s4 + $0x38] sm:$0xff] }
   0x7   :  { %1885 = vmatpush3.msk.msra.mxu0 %vm49_vm1, %v37_v5  ;;  %195 = vperm.xlu1 %2068, %v155_v12   ;;  %v2216_v44 = vld [vmem:[%s2429_s7] sm:$0xff]  ;;  %v157_v1 = vld [vmem:[%s2427_s4 + $0x28] sm:$0xff]  ;;  %vm2245_vm4 = vmpackc.low %vm208_vm3, %vm208_vm3 }
   0x8   :  { %1887 = vmatmul.mubr.msk.f32.vlgmr.msra.gmra.mrb[0].mxu0 %vm42_vm0, %v39_v6  ;;  %v156_v50 = vld [vmem:[%s2427_s4 + $0x20] sm:$0xff]  ;;  %v161_v6 = vld [vmem:[%s2427_s4 + $0x48] sm:$0xff] }
   0x9   :  { %185 = vperm.xlu0 %2067, %v153_v10   ;;  %v160_v5 = vld [vmem:[%s2427_s4 + $0x40] sm:$0xff] }
  0x82   :  { %v191_v23 = vpop.permute.xlu1 %190 }
  0x84   :  { %v181_v24 = vpop.permute.xlu0 %180 }
  0x86   :  { %v196_v28 = vpop.permute.xlu1 %195 }
  0x88   :  { %v186_v29 = vpop.permute.xlu0 %185 }
  0xdb   :  { %v1888_v15 = vpop.f32.mrb[0].mxu0 }
  0xdc   :  { %v125_v16 = vadd.f32 %v1888_v15, %v41_v13  ;;  %v119_v17 = vpop.f32.mrb[1].mxu0 }
  0xdd   :  { %v120_v18 = vadd.f32 %v119_v17, %v40_v14  ;;  %v134_v17 = vld [vmem:[%s2426_s3 + $0x30] sm:$0xff] }
  0xdf   :  { %v2004_v19 = vpack.c.bf16 %v125_v16, %v120_v18 }
  0xe1   :  { %2005 = vmatprep.subr.bf16.mxu1 %v2004_v19 }
  0xe2   :  { %2007 = vmatpush3.bf16.msra.mxu1 %v2004_v19 }
  0xe5   :  { %1894 = vmatmul.mubr.msk.f32.vlgmr.msra.gmra.mrb[0].mxu1 %vm208_vm3, %v129_v20 }
  0xe6   :  { %1896 = vmatprep.mubr.msk.f32.mxu1 %vm208_vm3, %v130_v21  ;;  %v135_v21 = vld [vmem:[%s2426_s3 + $0x38] sm:$0xff] }
  0xe9   :  { %1897 = vmatmul.mubr.msk.f32.gmra.mrb[2].mxu1 %vm208_vm3, %v131_v22  ;;  %v136_v22 = vld [vmem:[%s2426_s3 + $0x40] sm:$0xff] }
  0xea   :  { %1899 = vmatprep.mubr.msk.f32.mxu1 %vm208_vm3, %v132_v36 }
  0xed   :  { %1900 = vmatmul.mubr.msk.f32.gmra.mrb[4].mxu1 %vm208_vm3, %v133_v37 }
  0xee   :  { %1920 = vmatprep.mubr.msk.f32.mxu1 %vm208_vm3, %v134_v17 }
 0x1b8   :  { %v1895_v25 = vpop.f32.mrb[0].mxu1 }
 0x1b9   :  { %v293_v26 = vpop.f32.mrb[1].mxu1  ;;  %v299_v33 = vadd.f32 %v1895_v25, %v186_v29  ;;  %v139_v25 = vld [vmem:[%s2426_s3 + $0x58] sm:$0xff] }
 0x1ba   :  { %v294_v27 = vadd.f32 %v293_v26, %v181_v24  ;;  %v138_v24 = vld [vmem:[%s2426_s3 + $0x50] sm:$0xff] }
 0x1bc   :  { %322 = vxpose.xlu0.b32.start [1/2] (short) (narrow) %v294_v27, 16  ;;  %v1898_v30 = vpop.f32.mrb[2].mxu1 }
 0x1bd   :  { %v309_v31 = vadd.f32 %v1898_v30, %v196_v28  ;;  %v303_v32 = vpop.f32.mrb[3].mxu1 }
 0x1be   :  { %v304_v34 = vadd.f32 %v303_v32, %v191_v23  ;;  %v137_v23 = vld [vmem:[%s2426_s3 + $0x48] sm:$0xff] }
 0x1c0   :  { %323 = vxpose.xlu0.b32.end [2/2] (short) (narrow) %v299_v33, 16  ;;  %v2008_v35 = vpack.c.bf16 %v309_v31, %v304_v34  ;;  %v1901_v51 = vpop.f32.mrb[4].mxu1 }
 0x1c1   :  { %v313_v52 = vpop.f32.mrb[5].mxu1 }
 0x1c2   :  { %2009 = vmatprep.subr.bf16.mxu0 %v2008_v35 }
 0x1c3   :  { %2011 = vmatpush3.bf16.msra.mxu0 %v2008_v35 }
 0x23c   :  { %v338_v38 = vpop.trf.xlu0 }
 0x23d   :  { %1906 = vmatprep.mubr.msk.f32.mxu0 %vm208_vm3, %v338_v38 }
 0x240   :  { %v339_v39 = vpop.trf.xlu0 }
 0x241   :  { %1907 = vmatmul.mubr.msk.f32.vlgmr.msra.gmra.mrb[2].mxu0 %vm208_vm3, %v339_v39 }
 0x314   :  { %v1908_v40 = vpop.f32.mrb[2].mxu0 }
 0x315   :  { %v436_v42 = vmul.f32 0.33333334, %v1908_v40  ;;  %v426_v43 = vpop.f32.mrb[3].mxu0 }
 0x316   :  { %v435_v45 = vmul.f32 0.33333334, %v426_v43 }
 0x317   :  { %v438_v46 = vadd.f32 %v436_v42, %v2211_v41  ;;  %v162_v42 = vld [vmem:[%s2427_s4 + $0x50] sm:$0xff] }
 0x318   :  { %v437_v47 = vadd.f32 %v435_v45, %v2216_v44 }
 0x319   :  { %v442_v48 = vsel %vm208_vm3, %v438_v46, -inf }
 0x31a   :  { %443 = vmax.xlane.f32.xlu0 %v442_v48  ;;  %v439_v49 = vsel %vm208_vm3, %v437_v47, -inf }
 0x31b   :  { %440 = vmax.xlane.f32.xlu1 %v439_v49 }
 0x32c   :  { %200 = vperm.xlu1 %2068, %v156_v50  }
 0x3a7   :  { %v444_v53 = vpop.xlane.xlu0 %443 }
 0x3a8   :  { %v446_v54 = vsub.f32 %v438_v46, %v444_v53  ;;  %v441_v55 = vpop.xlane.xlu1 %440 }
 0x3a9   :  { %v445_v56 = vsub.f32 %v437_v47, %v441_v55 }
 0x3aa   :  { %v449_v57 = vmul.f32 1.442695, %v446_v54 }
 0x3ab   :  { %v447_v58 = vmul.f32 1.442695, %v445_v56 }
 0x3ac   :  { %2069 = vpow2.f32 %v449_v57  ;;  %v201_v59 = vpop.permute.xlu1 %200 }
 0x3ad   :  { %v314_v60 = vadd.f32 %v313_v52, %v201_v59  ;;  %2071 = vpow2.f32 %v447_v58 }
 0x3af   :  { %1913 = vmatprep.mubr.msk.f32.mxu0 %vm208_vm3, %v314_v60 }
 0x3b6   :  { %v2070_v61 = vpop.eup %2069 }
 0x3b7   :  { %v454_v62 = vsel %vm208_vm3, %v2070_v61, 0.0  ;;  %v2072_v63 = vpop.eup %2071 }
 0x3b8   :  { %455 = vadd.xlane.f32.xlu1 %v454_v62  ;;  %v451_v0 = vsel %vm208_vm3, %v2072_v63, 0.0 }
 0x3bc   :  { %452 = vadd.xlane.f32.xlu1 %v451_v0 }
 0x3cd   :  { %205 = vperm.xlu1 %2068, %v157_v1  }
 0x3d1   :  { %550 = vperm.xlu1 %2068, %v158_v2   ;;  %v163_v2 = vld [vmem:[%s2427_s4 + $0x58] sm:$0xff] }
 0x3d5   :  { %555 = vperm.xlu1 %2068, %v159_v3   ;;  %v164_v3 = vld [vmem:[%s2427_s4 + $0x60] sm:$0xff] }
 0x3d9   :  { %560 = vperm.xlu1 %2068, %v160_v5   ;;  %v165_v5 = vld [vmem:[%s2427_s4 + $0x68] sm:$0xff] }
 0x3dd   :  { %565 = vperm.xlu1 %2068, %v161_v6   ;;  %v166_v6 = vld [vmem:[%s2427_s4 + $0x70] sm:$0xff] }
 0x445   :  { %v456_v7 = vpop.xlane.xlu1 %455 }
 0x446   :  { %2073 = vrcp.f32 %v456_v7  ;;  %v167_v7 = vld [vmem:[%s2427_s4 + $0x78] sm:$0xff] }
 0x449   :  { %v453_v8 = vpop.xlane.xlu1 %452 }
 0x44a   :  { %2075 = vrcp.f32 %v453_v8 }
 0x44d   :  { %v206_v15 = vpop.permute.xlu1 %205 }
 0x44e   :  { %v319_v16 = vadd.f32 %v1901_v51, %v206_v15 }
 0x450   :  { %v2074_v9 = vpop.eup %2073 }
 0x451   :  { %v460_v12 = vmul.f32 %v2074_v9, %v2070_v61  ;;  %v551_v26 = vpop.permute.xlu1 %550 }
 0x454   :  { %v2076_v10 = vpop.eup %2075 }
 0x455   :  { %v459_v11 = vmul.f32 %v2076_v10, %v2072_v63  ;;  %v556_v27 = vpop.permute.xlu1 %555 }
 0x457   :  { %v2012_v14 = vpack.c.bf16 %v460_v12, %v459_v11 }
 0x459   :  { %2014 = vmatprep.subr.msk.bf16.mxu0 %vm2245_vm4, %v2012_v14  ;;  %v561_v28 = vpop.permute.xlu1 %560 }
 0x45a   :  { %2017 = vmatpush3.bf16.xpose.msk.msra.mxu0 %vm2245_vm4, %v2012_v14 }
 0x45d   :  { %v566_v32 = vpop.permute.xlu1 %565 }
 0x461   :  { %1914 = vmatmul.mubr.msk.f32.vlgmr.msra.gmra.mrb[4].mxu0 %vm208_vm3, %v319_v16 }
 0x534   :  { %v1915_v18 = vpop.f32.mrb[4].mxu0 }
 0x535   :  { %v539_v19 = vpop.f32.mrb[5].mxu0 }
 0x536   :  { %v2018_v20 = vpack.c.bf16 %v1915_v18, %v539_v19  ;;  %v140_v18 = vld [vmem:[%s2426_s3 + $0x60] sm:$0xff] }
 0x538   :  { %2019 = vmatprep.subr.bf16.mxu1 %v2018_v20 }
 0x539   :  { %2021 = vmatpush3.bf16.msra.mxu1 %v2018_v20 }
 0x53c   :  { %1921 = vmatmul.mubr.msk.f32.vlgmr.msra.gmra.mrb[6].mxu1 %vm208_vm3, %v135_v21 }
 0x53d   :  { %1923 = vmatprep.mubr.msk.f32.mxu1 %vm208_vm3, %v136_v22  ;;  %v141_v22 = vld [vmem:[%s2426_s3 + $0x68] sm:$0xff] }
 0x540   :  { %1924 = vmatmul.mubr.msk.f32.gmra.mrb[8].mxu1 %vm208_vm3, %v137_v23  ;;  %v142_v23 = vld [vmem:[%s2426_s3 + $0x70] sm:$0xff] }
 0x541   :  { %1926 = vmatprep.mubr.msk.f32.mxu1 %vm208_vm3, %v138_v24  ;;  %v143_v24 = vld [vmem:[%s2426_s3 + $0x78] sm:$0xff] }
 0x544   :  { %1927 = vmatmul.mubr.msk.f32.gmra.mrb[10].mxu1 %vm208_vm3, %v139_v25 }
 0x545   :  { %1947 = vmatprep.mubr.msk.f32.mxu1 %vm208_vm3, %v140_v18 }
 0x60f   :  { %v1922_v29 = vpop.f32.mrb[6].mxu1 }
 0x610   :  { %v662_v30 = vpop.f32.mrb[7].mxu1  ;;  %v668_v36 = vadd.f32 %v1922_v29, %v556_v27 }
 0x611   :  { %v663_v31 = vadd.f32 %v662_v30, %v551_v26 }
 0x613   :  { %v1925_v33 = vpop.f32.mrb[8].mxu1  ;;  %691 = vxpose.xlu0.b32.start [1/2] (short) (narrow) %v663_v31, 16 }
 0x614   :  { %v678_v34 = vadd.f32 %v1925_v33, %v566_v32  ;;  %v672_v35 = vpop.f32.mrb[9].mxu1 }
 0x615   :  { %v673_v37 = vadd.f32 %v672_v35, %v561_v28 }
 0x617   :  { %v2022_v38 = vpack.c.bf16 %v678_v34, %v673_v37  ;;  %692 = vxpose.xlu0.b32.end [2/2] (short) (narrow) %v668_v36, 16  ;;  %v1928_v39 = vpop.f32.mrb[10].mxu1 }
 0x618   :  { %v682_v40 = vpop.f32.mrb[11].mxu1 }
 0x619   :  { %2023 = vmatprep.subr.bf16.mxu0 %v2022_v38 }
 0x61a   :  { %2025 = vmatpush3.bf16.msra.mxu0 %v2022_v38  ;;  %v144_v38 = vld [vmem:[%s2426_s3 + $0x80] sm:$0xff] }
 0x640   :  { %570 = vperm.xlu0 %2067, %v162_v42  }
 0x693   :  { %v707_v43 = vpop.trf.xlu0 }
 0x694   :  { %1933 = vmatprep.mubr.msk.f32.mxu0 %vm208_vm3, %v707_v43 }
 0x697   :  { %v708_v45 = vpop.trf.xlu0 }
 0x698   :  { %1934 = vmatmul.mubr.msk.f32.vlgmr.msra.gmra.mrb[6].mxu0 %vm208_vm3, %v708_v45 }
 0x6bf   :  { %v571_v46 = vpop.permute.xlu0 %570 }
 0x6c0   :  { %v683_v47 = vadd.f32 %v682_v40, %v571_v46 }
 0x6c2   :  { %1940 = vmatprep.mubr.msk.f32.mxu0 %vm208_vm3, %v683_v47 }
 0x76b   :  { %v1935_v48 = vpop.f32.mrb[6].mxu0 }
 0x76c   :  { %v795_v49 = vpop.f32.mrb[7].mxu0  ;;  %v805_v50 = vmul.f32 0.33333334, %v1935_v48 }
 0x76d   :  { %v804_v51 = vmul.f32 0.33333334, %v795_v49 }
 0x76e   :  { %v807_v54 = vadd.f32 %v805_v50, %v2211_v41 }
 0x76f   :  { %v806_v52 = vadd.f32 %v804_v51, %v2216_v44 }
 0x770   :  { %v811_v55 = vsel %vm208_vm3, %v807_v54, -inf }
 0x771   :  { %v808_v53 = vsel %vm208_vm3, %v806_v52, -inf }
 0x772   :  { %809 = vmax.xlane.f32.xlu1 %v808_v53  ;;  %v168_v53 = vld [vmem:[%s2427_s4 + $0x80] sm:$0xff] }
 0x776   :  { %812 = vmax.xlane.f32.xlu1 %v811_v55 }
 0x7ff   :  { %v810_v56 = vpop.xlane.xlu1 %809 }
 0x800   :  { %v814_v57 = vsub.f32 %v806_v52, %v810_v56 }
 0x802   :  { %v816_v60 = vmul.f32 1.442695, %v814_v57 }
 0x803   :  { %v813_v58 = vpop.xlane.xlu1 %812 }
 0x804   :  { %v815_v59 = vsub.f32 %v807_v54, %v813_v58 }
 0x806   :  { %v818_v61 = vmul.f32 1.442695, %v815_v59 }
 0x808   :  { %2077 = vpow2.f32 %v818_v61 }
 0x809   :  { %2079 = vpow2.f32 %v816_v60 }
 0x812   :  { %v2078_v62 = vpop.eup %2077 }
 0x813   :  { %v823_v63 = vsel %vm208_vm3, %v2078_v62, 0.0  ;;  %v2080_v0 = vpop.eup %2079 }
 0x814   :  { %824 = vadd.xlane.f32.xlu1 %v823_v63  ;;  %v820_v1 = vsel %vm208_vm3, %v2080_v0, 0.0 }
 0x818   :  { %821 = vadd.xlane.f32.xlu1 %v820_v1 }
 0x829   :  { %575 = vperm.xlu1 %2068, %v163_v2  }
 0x82d   :  { %919 = vperm.xlu1 %2068, %v164_v3   ;;  %v169_v3 = vld [vmem:[%s2427_s4 + $0x88] sm:$0xff] }
 0x831   :  { %924 = vperm.xlu1 %2068, %v165_v5   ;;  %v170_v5 = vld [vmem:[%s2427_s4 + $0x90] sm:$0xff] }
 0x835   :  { %929 = vperm.xlu1 %2068, %v166_v6   ;;  %v171_v6 = vld [vmem:[%s2427_s4 + $0x98] sm:$0xff] }
 0x839   :  { %934 = vperm.xlu1 %2068, %v167_v7   ;;  %v172_v7 = vld [vmem:[%s2427_s4 + $0xa0] sm:$0xff] }
 0x8a1   :  { %v825_v8 = vpop.xlane.xlu1 %824 }
 0x8a2   :  { %2081 = vrcp.f32 %v825_v8  ;;  %v173_v8 = vld [vmem:[%s2427_s4 + $0xa8] sm:$0xff] }
 0x8a5   :  { %v822_v9 = vpop.xlane.xlu1 %821 }
 0x8a6   :  { %2083 = vrcp.f32 %v822_v9 }
 0x8a9   :  { %v576_v16 = vpop.permute.xlu1 %575 }
 0x8aa   :  { %v688_v17 = vadd.f32 %v1928_v39, %v576_v16  ;;  %v145_v39 = vld [vmem:[%s2426_s3 + $0x88] sm:$0xff] }
 0x8ac   :  { %v2082_v10 = vpop.eup %2081 }
 0x8ad   :  { %v829_v14 = vmul.f32 %v2082_v10, %v2078_v62  ;;  %v920_v25 = vpop.permute.xlu1 %919 }
 0x8b0   :  { %v2084_v11 = vpop.eup %2083 }
 0x8b1   :  { %v828_v12 = vmul.f32 %v2084_v11, %v2080_v0  ;;  %v925_v26 = vpop.permute.xlu1 %924 }
 0x8b3   :  { %v2026_v15 = vpack.c.bf16 %v829_v14, %v828_v12 }
 0x8b5   :  { %2028 = vmatprep.subr.msk.bf16.mxu0 %vm2245_vm4, %v2026_v15  ;;  %v930_v27 = vpop.permute.xlu1 %929 }
 0x8b6   :  { %2031 = vmatpush3.bf16.xpose.msk.msra.mxu0 %vm2245_vm4, %v2026_v15 }
 0x8b9   :  { %v935_v31 = vpop.permute.xlu1 %934 }
 0x8bd   :  { %1941 = vmatmul.mubr.msk.f32.vlgmr.msra.gmra.mrb[8].mxu0 %vm208_vm3, %v688_v17 }
 0x990   :  { %v1942_v19 = vpop.f32.mrb[8].mxu0 }
 0x991   :  { %v908_v20 = vpop.f32.mrb[9].mxu0 }
 0x992   :  { %v2032_v21 = vpack.c.bf16 %v1942_v19, %v908_v20  ;;  %v146_v19 = vld [vmem:[%s2426_s3 + $0x90] sm:$0xff] }
 0x994   :  { %2033 = vmatprep.subr.bf16.mxu1 %v2032_v21 }
 0x995   :  { %2035 = vmatpush3.bf16.msra.mxu1 %v2032_v21 }
 0x998   :  { %1948 = vmatmul.mubr.msk.f32.vlgmr.msra.gmra.mrb[12].mxu1 %vm208_vm3, %v141_v22 }
 0x999   :  { %1950 = vmatprep.mubr.msk.f32.mxu1 %vm208_vm3, %v142_v23  ;;  %v147_v23 = vld [vmem:[%s2426_s3 + $0x98] sm:$0xff] }
 0x99c   :  { %1951 = vmatmul.mubr.msk.f32.gmra.mrb[14].mxu1 %vm208_vm3, %v143_v24  ;;  %v148_v24 = vld [vmem:[%s2426_s3 + $0xa0] sm:$0xff] }
 0x99d   :  { %1953 = vmatprep.mubr.msk.f32.mxu1 %vm208_vm3, %v144_v38 }
 0x9a0   :  { %1954 = vmatmul.mubr.msk.f32.gmra.mrb[16].mxu1 %vm208_vm3, %v145_v39 }
 0x9a1   :  { %1974 = vmatprep.mubr.msk.f32.mxu1 %vm208_vm3, %v146_v19  ;;  %v1655_v19 = vld [vmem:[%s2431_s5] sm:$0x1f] }
 0xa6b   :  { %v1949_v28 = vpop.f32.mrb[12].mxu1 }
 0xa6c   :  { %v1031_v29 = vpop.f32.mrb[13].mxu1  ;;  %v1037_v35 = vadd.f32 %v1949_v28, %v925_v26  ;;  %v150_v26 = vld [vmem:[%s2426_s3 + $0xb0] sm:$0xff] }
 0xa6d   :  { %v1032_v30 = vadd.f32 %v1031_v29, %v920_v25  ;;  %v149_v25 = vld [vmem:[%s2426_s3 + $0xa8] sm:$0xff] }
 0xa6f   :  { %v1952_v32 = vpop.f32.mrb[14].mxu1  ;;  %1060 = vxpose.xlu1.b32.start [1/2] (short) (narrow) %v1032_v30, 16 }
 0xa70   :  { %v1047_v33 = vadd.f32 %v1952_v32, %v935_v31  ;;  %v1041_v34 = vpop.f32.mrb[15].mxu1 }
 0xa71   :  { %v1042_v36 = vadd.f32 %v1041_v34, %v930_v27  ;;  %v151_v27 = vld [vmem:[%s2426_s3 + $0xb8] sm:$0xff] }
 0xa73   :  { %v2036_v37 = vpack.c.bf16 %v1047_v33, %v1042_v36  ;;  %1061 = vxpose.xlu1.b32.end [2/2] (short) (narrow) %v1037_v35, 16  ;;  %v1955_v52 = vpop.f32.mrb[16].mxu1 }
 0xa74   :  { %v1051_v54 = vpop.f32.mrb[17].mxu1 }
 0xa75   :  { %2037 = vmatprep.subr.bf16.mxu0 %v2036_v37 }
 0xa76   :  { %2039 = vmatpush3.bf16.msra.mxu0 %v2036_v37 }
 0xaef   :  { %v1076_v40 = vpop.trf.xlu1 }
 0xaf0   :  { %1960 = vmatprep.mubr.msk.f32.mxu0 %vm208_vm3, %v1076_v40 }
 0xaf3   :  { %v1077_v42 = vpop.trf.xlu1 }
 0xaf4   :  { %1961 = vmatmul.mubr.msk.f32.vlgmr.msra.gmra.mrb[10].mxu0 %vm208_vm3, %v1077_v42 }
 0xbc7   :  { %v1962_v43 = vpop.f32.mrb[10].mxu0 }
 0xbc8   :  { %v1164_v45 = vpop.f32.mrb[11].mxu0  ;;  %v1174_v46 = vmul.f32 0.33333334, %v1962_v43  ;;  %v175_v43 = vld [vmem:[%s2427_s4 + $0xb8] sm:$0xff] }
 0xbc9   :  { %v1173_v47 = vmul.f32 0.33333334, %v1164_v45 }
 0xbca   :  { %v1176_v50 = vadd.f32 %v1174_v46, %v2211_v41 }
 0xbcb   :  { %v1175_v48 = vadd.f32 %v1173_v47, %v2216_v44 }
 0xbcc   :  { %v1180_v51 = vsel %vm208_vm3, %v1176_v50, -inf }
 0xbcd   :  { %v1177_v49 = vsel %vm208_vm3, %v1175_v48, -inf }
 0xbce   :  { %1178 = vmax.xlane.f32.xlu0 %v1177_v49 }
 0xbd2   :  { %1181 = vmax.xlane.f32.xlu0 %v1180_v51 }
 0xbe8   :  { %939 = vperm.xlu0 %2067, %v168_v53  }
 0xc5b   :  { %v1179_v55 = vpop.xlane.xlu0 %1178 }
 0xc5c   :  { %v1183_v56 = vsub.f32 %v1175_v48, %v1179_v55 }
 0xc5e   :  { %v1185_v57 = vmul.f32 1.442695, %v1183_v56 }
 0xc5f   :  { %v1182_v58 = vpop.xlane.xlu0 %1181 }
 0xc60   :  { %2085 = vpow2.f32 %v1185_v57  ;;  %v1184_v59 = vsub.f32 %v1176_v50, %v1182_v58 }
 0xc62   :  { %v1187_v60 = vmul.f32 1.442695, %v1184_v59 }
 0xc64   :  { %2087 = vpow2.f32 %v1187_v60 }
 0xc67   :  { %v940_v61 = vpop.permute.xlu0 %939 }
 0xc68   :  { %v1052_v62 = vadd.f32 %v1051_v54, %v940_v61 }
 0xc6a   :  { %v2086_v63 = vpop.eup %2085  ;;  %1967 = vmatprep.mubr.msk.f32.mxu0 %vm208_vm3, %v1052_v62 }
 0xc6b   :  { %v1189_v0 = vsel %vm208_vm3, %v2086_v63, 0.0 }
 0xc6c   :  { %1190 = vadd.xlane.f32.xlu0 %v1189_v0  ;;  %v174_v0 = vld [vmem:[%s2427_s4 + $0xb0] sm:$0xff] }
 0xc6e   :  { %v2088_v1 = vpop.eup %2087 }
 0xc6f   :  { %v1192_v2 = vsel %vm208_vm3, %v2088_v1, 0.0 }
 0xc70   :  { %1193 = vadd.xlane.f32.xlu1 %v1192_v2 }
 0xc82   :  { %944 = vperm.xlu0 %2067, %v169_v3  }
 0xc86   :  { %1288 = vperm.xlu0 %2067, %v170_v5  }
 0xc8a   :  { %1293 = vperm.xlu0 %2067, %v171_v6  }
 0xc8e   :  { %1298 = vperm.xlu0 %2067, %v172_v7  }
 0xc92   :  { %1303 = vperm.xlu0 %2067, %v173_v8  }
 0xcf9   :  { %v1191_v9 = vpop.xlane.xlu0 %1190 }
 0xcfa   :  { %2089 = vrcp.f32 %v1191_v9 }
 0xcfd   :  { %v1194_v10 = vpop.xlane.xlu1 %1193 }
 0xcfe   :  { %2091 = vrcp.f32 %v1194_v10 }
 0xd01   :  { %v945_v17 = vpop.permute.xlu0 %944 }
 0xd02   :  { %v1057_v18 = vadd.f32 %v1955_v52, %v945_v17 }
 0xd04   :  { %v2090_v11 = vpop.eup %2089 }
 0xd05   :  { %v1197_v14 = vmul.f32 %v2090_v11, %v2086_v63  ;;  %v1289_v28 = vpop.permute.xlu0 %1288 }
 0xd08   :  { %v2092_v12 = vpop.eup %2091 }
 0xd09   :  { %v1198_v15 = vmul.f32 %v2092_v12, %v2088_v1  ;;  %v1294_v29 = vpop.permute.xlu0 %1293  ;;  %v1656_v1 = vld [vmem:[%s2430_s6] sm:$0x1f] }
 0xd0b   :  { %v2040_v16 = vpack.c.bf16 %v1198_v15, %v1197_v14  ;;  %v2107_v15 = vmov 0.0|0.0  }
 0xd0d   :  { %2042 = vmatprep.subr.msk.bf16.mxu0 %vm2245_vm4, %v2040_v16  ;;  %v1299_v30 = vpop.permute.xlu0 %1298 }
 0xd0e   :  { %2045 = vmatpush3.bf16.xpose.msk.msra.mxu0 %vm2245_vm4, %v2040_v16 }
 0xd11   :  { %v1304_v34 = vpop.permute.xlu0 %1303 }
 0xd15   :  { %1968 = vmatmul.mubr.msk.f32.vlgmr.msra.gmra.mrb[12].mxu0 %vm208_vm3, %v1057_v18 }
 0xde8   :  { %v1969_v20 = vpop.f32.mrb[12].mxu0 }
 0xde9   :  { %v1277_v21 = vpop.f32.mrb[13].mxu0 }
 0xdea   :  { %v2046_v22 = vpack.c.bf16 %v1969_v20, %v1277_v21 }
 0xdec   :  { %2047 = vmatprep.subr.bf16.mxu1 %v2046_v22 }
 0xded   :  { %2049 = vmatpush3.bf16.msra.mxu1 %v2046_v22 }
 0xdee   :  { %2060 = vmatprep.subr.bf16.mxu1 %v2107_v15 }
 0xdf0   :  { %1975 = vmatmul.mubr.msk.f32.vlgmr.msra.gmra.mrb[18].mxu1 %vm208_vm3, %v147_v23 }
 0xdf1   :  { %1977 = vmatprep.mubr.msk.f32.mxu1 %vm208_vm3, %v148_v24 }
 0xdf4   :  { %1978 = vmatmul.mubr.msk.f32.gmra.mrb[20].mxu1 %vm208_vm3, %v149_v25 }
 0xdf5   :  { %1980 = vmatprep.mubr.msk.f32.mxu1 %vm208_vm3, %v150_v26 }
 0xdf8   :  { %1981 = vmatmul.mubr.msk.f32.gmra.mrb[22].mxu1 %vm208_vm3, %v151_v27 }
 0xdf9   :  { %2001 = vmatprep.mubr.msk.f32.mxu1 %vm2108_vm5, %v2105_v4 }
 0xec3   :  { %v1976_v31 = vpop.f32.mrb[18].mxu1 }
 0xec4   :  { %v1400_v32 = vpop.f32.mrb[19].mxu1  ;;  %v1406_v38 = vadd.f32 %v1976_v31, %v1294_v29 }
 0xec5   :  { %v1401_v33 = vadd.f32 %v1400_v32, %v1289_v28 }
 0xec7   :  { %v1979_v35 = vpop.f32.mrb[20].mxu1  ;;  %1429 = vxpose.xlu1.b32.start [1/2] (short) (narrow) %v1401_v33, 16 }
 0xec8   :  { %v1416_v36 = vadd.f32 %v1979_v35, %v1304_v34  ;;  %v1410_v37 = vpop.f32.mrb[21].mxu1 }
 0xec9   :  { %v1411_v39 = vadd.f32 %v1410_v37, %v1299_v30 }
 0xecb   :  { %v2050_v40 = vpack.c.bf16 %v1416_v36, %v1411_v39  ;;  %1430 = vxpose.xlu1.b32.end [2/2] (short) (narrow) %v1406_v38, 16  ;;  %v1982_v42 = vpop.f32.mrb[22].mxu1 }
 0xecd   :  { %2051 = vmatprep.subr.bf16.mxu0 %v2050_v40 }
 0xece   :  { %2053 = vmatpush3.bf16.msra.mxu0 %v2050_v40 }
 0xee9   :  { %1313 = vperm.xlu1 %2068, %v175_v43  }
 0xf47   :  { %v1445_v45 = vpop.trf.xlu1 }
 0xf48   :  { %1987 = vmatprep.mubr.msk.f32.mxu0 %vm208_vm3, %v1445_v45 }
 0xf4b   :  { %v1446_v46 = vpop.trf.xlu1 }
 0xf4c   :  { %1988 = vmatmul.mubr.msk.f32.vlgmr.msra.gmra.mrb[14].mxu0 %vm208_vm3, %v1446_v46 }
 0xf68   :  { %v1314_v12 = vpop.permute.xlu1 %1313 }
 0xf69   :  { %v1426_v14 = vadd.f32 %v1982_v42, %v1314_v12 }
0x101f   :  { %v1989_v47 = vpop.f32.mrb[14].mxu0 }
0x1020   :  { %v1533_v48 = vpop.f32.mrb[15].mxu0  ;;  %v1543_v49 = vmul.f32 0.33333334, %v1989_v47 }
0x1021   :  { %v1542_v50 = vmul.f32 0.33333334, %v1533_v48 }
0x1022   :  { %v1545_v53 = vadd.f32 %v1543_v49, %v2211_v41  ;;  %v1420_v41 = vpop.f32.mrb[23].mxu1 }
0x1023   :  { %v1544_v51 = vadd.f32 %v1542_v50, %v2216_v44 }
0x1024   :  { %v1549_v54 = vsel %vm208_vm3, %v1545_v53, -inf }
0x1025   :  { %v1546_v52 = vsel %vm208_vm3, %v1544_v51, -inf }
0x1026   :  { %1547 = vmax.xlane.f32.xlu0 %v1546_v52 }
0x102a   :  { %1550 = vmax.xlane.f32.xlu0 %v1549_v54 }
0x10b3   :  { %v1548_v55 = vpop.xlane.xlu0 %1547 }
0x10b4   :  { %v1552_v56 = vsub.f32 %v1544_v51, %v1548_v55 }
0x10b6   :  { %v1554_v59 = vmul.f32 1.442695, %v1552_v56 }
0x10b7   :  { %v1551_v57 = vpop.xlane.xlu0 %1550 }
0x10b8   :  { %v1553_v58 = vsub.f32 %v1545_v53, %v1551_v57 }
0x10ba   :  { %v1556_v60 = vmul.f32 1.442695, %v1553_v58 }
0x10bc   :  { %2093 = vpow2.f32 %v1556_v60 }
0x10bd   :  { %2095 = vpow2.f32 %v1554_v59 }
0x10c6   :  { %v2094_v61 = vpop.eup %2093 }
0x10c7   :  { %v1561_v62 = vsel %vm208_vm3, %v2094_v61, 0.0  ;;  %v2096_v44 = vpop.eup %2095 }
0x10c8   :  { %1562 = vadd.xlane.f32.xlu0 %v1561_v62  ;;  %v1558_v63 = vsel %vm208_vm3, %v2096_v44, 0.0 }
0x10cc   :  { %1559 = vadd.xlane.f32.xlu0 %v1558_v63 }
0x10e2   :  { %1308 = vperm.xlu0 %2067, %v174_v0  }
0x10e6   :  { %1659 = vperm.xlu0 %2067, %v1656_v1  }
0x1155   :  { %v1563_v2 = vpop.xlane.xlu0 %1562 }
0x1156   :  { %2097 = vrcp.f32 %v1563_v2 }
0x1159   :  { %v1560_v3 = vpop.xlane.xlu0 %1559 }
0x115a   :  { %2099 = vrcp.f32 %v1560_v3 }
0x1160   :  { %v2098_v6 = vpop.eup %2097 }
0x1161   :  { %v1309_v5 = vpop.permute.xlu0 %1308  ;;  %v1567_v10 = vmul.f32 %v2098_v6, %v2094_v61 }
0x1162   :  { %v1421_v7 = vadd.f32 %v1420_v41, %v1309_v5 }
0x1164   :  { %v2100_v8 = vpop.eup %2099  ;;  %1994 = vmatprep.mubr.msk.f32.mxu0 %vm208_vm3, %v1421_v7 }
0x1165   :  { %v1566_v9 = vmul.f32 %v2100_v8, %v2096_v44  ;;  %v1660_v13 = vpop.permute.xlu0 %1659 }
0x1167   :  { %v2054_v11 = vpack.c.bf16 %v1567_v10, %v1566_v9 }
0x1169   :  { %2056 = vmatprep.subr.msk.bf16.mxu0 %vm2245_vm4, %v2054_v11 }
0x116a   :  { %2059 = vmatpush3.bf16.xpose.msk.msra.mxu0 %vm2245_vm4, %v2054_v11 }
0x1171   :  { %1995 = vmatmul.mubr.msk.f32.vlgmr.msra.gmra.mrb[16].mxu0 %vm208_vm3, %v1426_v14 }
0x1244   :  { %v1996_v16 = vpop.f32.mrb[16].mxu0 }
0x1245   :  { %v1646_v17 = vpop.f32.mrb[17].mxu0 }
0x1246   :  { %v2061_v18 = vpack.c.bf16 %v1996_v16, %v1646_v17 }
0x1248   :  { %2062 = vmatpush3.bf16.msra.mxu1 %v2061_v18 }
0x124b   :  { %2002 = vmatmul.mubr.msk.f32.vlgmr.msra.gmra.mrb[24].mxu1 %vm208_vm3, %v1655_v19 }
0x131e   :  { %v1731_v20 = vpop.f32.mrb[24].mxu1 }
0x131f   :  { %v1732_v21 = vadd.f32 %v1731_v20, %v1660_v13  ;;  %v2003_v22 = vpop.f32.mrb[25].mxu1 }
0x1321   :  { %v1736_v23 = vsel %vm1735_vm6, %v1732_v21, -inf }
0x1322   :  { %v1737_v24 = vrot.slane %v1736_v23, 4 }
0x1324   :  { %v1738_v25 = vmax.f32 %v1736_v23, %v1737_v24 }
0x1326   :  { %v1739_v4 = vrot.slane %v1738_v25, 2 }
0x1328   :  { %v1740_v26 = vmax.f32 %v1738_v25, %v1739_v4 }
0x132a   :  { %v1741_v27 = vrot.slane %v1740_v26, 1 }
0x132c   :  { %v1742_v28 = vmax.f32 %v1740_v26, %v1741_v27 }
0x132e   :  { %v1743_v29 = vsub.f32 %v1732_v21, %v1742_v28 }
0x1330   :  { %v1744_v30 = vmul.f32 1.442695, %v1743_v29 }
0x1332   :  { %2101 = vpow2.f32 %v1744_v30 }
0x133c   :  { %v2102_v31 = vpop.eup %2101 }
0x133d   :  { %v1746_v32 = vsel %vm1735_vm6, %v2102_v31, 0.0 }
0x133e   :  { %v1747_v33 = vrot.slane %v1746_v32, 4 }
0x1340   :  { %v1748_v34 = vadd.f32 %v1747_v33, %v1746_v32 }
0x1342   :  { %v1749_v35 = vrot.slane %v1748_v34, 2 }
0x1344   :  { %v1750_v36 = vadd.f32 %v1749_v35, %v1748_v34 }
0x1346   :  { %v1751_v37 = vrot.slane %v1750_v36, 1 }
0x1348   :  { %v1752_v38 = vadd.f32 %v1751_v37, %v1750_v36 }
0x134a   :  { %2103 = vlog2.f32 %v1752_v38 }
0x1354   :  { %v2104_v39 = vpop.eup %2103 }
0x1355   :  { %v1754_v40 = vmul.f32 0.6931472, %v2104_v39 }
0x1357   :  { %v1755_v42 = vsub.f32 %v1743_v29, %v1754_v40 }
0x1359   :  { %1756 = vst.msk [vmem:[%s2432_s8] sm:$0x1f] %vm1735_vm6, %v1755_v42 }

</bundles_post_ra>
